<compile_context>
chip_gen: v6e
topology: v6e:2x2x1
jax: 0.10.0
libtpu: 0.0.40
codegen_flags: <defaults>
</compile_context>

<pallas_src>
import functools

import jax
import jax.numpy as jnp
from jax import lax
from jax.experimental import pallas as pl
from jax.experimental.pallas import tpu as pltpu

LANE = 128       # lane width: hidden dim is zero-padded to this
SUB_ROWS = 128   # in-kernel row chunk: keeps live vregs ~50 -> spill-free


def _round_up(n, m):
    return (n + m - 1) // m * m


def _resmlp_predictor_kernel(x_ref, w_in_ref, b_in_ref, w_l_ref, b_l_ref,
                             w_out_ref, b_out_ref, out_ref, *,
                             num_layers, sub_rows, acc_dtype):
    """One (tb, in_dim) f32 row-tile of x -> (tb, 1) f32 tanh output."""
    nsub = x_ref.shape[0] // sub_rows

    def process(r0):
        # In-kernel bf16 cast of x (VPU, hidden under DMA/MXU): HBM only ever
        # sees a single f32 read of x, no wrapper-side cast/pad round trip.
        x = x_ref[pl.ds(r0, sub_rows), :].astype(jnp.bfloat16)

        # linear_in (MXU, f32 accumulation)
        h = jnp.dot(x, w_in_ref[...], preferred_element_type=jnp.float32)
        h = (h + b_in_ref[...]).astype(acc_dtype)

        # Residual MLP stack. num_layers is tiny (2) -> static unroll is fine.
        mid = h
        for i in range(num_layers):
            y = jnp.dot(mid.astype(jnp.bfloat16), w_l_ref[i],
                        preferred_element_type=jnp.float32) + b_l_ref[i]
            mid = jnp.maximum(y, 0.0).astype(acc_dtype)

        res = (mid + h).astype(jnp.bfloat16)   # residual add

        # linear_out + tanh (f32 epilogue).
        # TODO(synk): if a bundle dump shows vmatmul pushes binding, replace this
        # (sub,128)@(128,1) dot with a VPU multiply-by-broadcast-row + XLU row-sum.
        flow = jnp.tanh(
            jnp.dot(res, w_out_ref[...], preferred_element_type=jnp.float32)
            + b_out_ref[...])
        # TODO(synk): optional lane-dense (tb//128, 128) output relayout via XLU;
        # write stream is tiny here, so only adopt if a bundle dump justifies it.
        out_ref[pl.ds(r0, sub_rows), :] = flow.astype(out_ref.dtype)

    if nsub == 1:
        process(0)
    else:
        def body(j, carry):
            process(pl.multiple_of(j * sub_rows, sub_rows))
            return carry
        lax.fori_loop(0, nsub, body, 0)


def prepare_params(params):
    """Pad the hidden/fan_out dim to 128 lanes and cast matmul weights to bf16.

    Zero padding is mathematically exact: padded output columns stay zero
    through relu and the residual add, and padded fan-in rows multiply zeros.
    (One-time parameter preprocessing -- not per-call work.)
    """
    H = params["w_in"].shape[1]
    H_pad = _round_up(H, LANE)
    p = H_pad - H

    return {
        "w_in": jnp.pad(params["w_in"], ((0, 0), (0, p))).astype(jnp.bfloat16),
        "b_in": jnp.pad(params["b_in"], ((0, 0), (0, p))).astype(jnp.float32),
        "w_layers": jnp.pad(params["w_layers"],
                            ((0, 0), (0, p), (0, p))).astype(jnp.bfloat16),
        "b_layers": jnp.pad(params["b_layers"],
                            ((0, 0), (0, 0), (0, p))).astype(jnp.float32),
        "w_out": jnp.pad(params["w_out"], ((0, p), (0, 0))).astype(jnp.bfloat16),
        "b_out": params["b_out"].astype(jnp.float32),
    }


def _default_bf16_epilogue():
    """bf16 bias/relu/residual only on chips with a bf16 VPU (v6e / v7x)."""
    try:
        kind = jax.devices()[0].device_kind.lower()
    except Exception:
        return False
    return not any(t in kind for t in ("v2", "v3", "v4", "v5"))


def _pick_tiles(B, block_rows):
    """Row-tile tb and in-kernel sub-block size.

    - tb is a multiple of 16 (bf16 sublane packing of the in-kernel cast).
    - tb is capped near B/2 so nb >= 2 whenever B allows it (v7x megacore).
    - tb is a multiple of SUB_ROWS when tb > SUB_ROWS so the in-kernel chunk
      loop is exact and each chunk stays spill-free.
    """
    half_b = max(16, _round_up((B + 1) // 2, 16))
    tb = min(_round_up(block_rows, 16), half_b)
    if tb > SUB_ROWS:
        tb = _round_up(tb, SUB_ROWS)
    sub = min(SUB_ROWS, tb)
    return tb, sub


def resmlp_predictor(x, prepared, *, num_layers, block_rows=4096,
                     bf16_epilogue=None):
    """x: (B, in_dim) float32 (kept f32 in HBM). prepared: prepare_params() output."""
    B, in_dim = x.shape
    H_pad = prepared["w_in"].shape[1]
    assert prepared["w_layers"].shape[0] == num_layers

    if bf16_epilogue is None:
        bf16_epilogue = _default_bf16_epilogue()
    acc_dtype = jnp.bfloat16 if bf16_epilogue else jnp.float32

    tb, sub = _pick_tiles(B, block_rows)
    B_pad = _round_up(B, tb)
    nb = B_pad // tb

    if B_pad != B:   # zero-pad the (small) batch remainder; rows sliced off below
        x = jnp.pad(x, ((0, B_pad - B), (0, 0)))

    weights = (prepared["w_in"], prepared["b_in"],
               prepared["w_layers"], prepared["b_layers"],
               prepared["w_out"], prepared["b_out"])

    def resident_spec(arr):  # constant index_map -> fetched once, stays in VMEM
        n = arr.ndim
        return pl.BlockSpec(arr.shape, lambda i, _n=n: (0,) * _n)

    cost = pl.CostEstimate(
        flops=2 * B_pad * (in_dim * H_pad + num_layers * H_pad * H_pad + H_pad),
        transcendentals=B_pad,
        bytes_accessed=(x.size * x.dtype.itemsize
                        + sum(w.size * w.dtype.itemsize for w in weights)
                        + B_pad * 4),
    )

    out = pl.pallas_call(
        functools.partial(_resmlp_predictor_kernel,
                          num_layers=num_layers, sub_rows=sub,
                          acc_dtype=acc_dtype),
        out_shape=jax.ShapeDtypeStruct((B_pad, 1), jnp.float32),
        grid=(nb,),
        in_specs=[pl.BlockSpec((tb, in_dim), lambda i: (i, 0))]
                 + [resident_spec(w) for w in weights],
        out_specs=pl.BlockSpec((tb, 1), lambda i: (i, 0)),
        compiler_params=pltpu.CompilerParams(
            dimension_semantics=("parallel",),
            vmem_limit_bytes=32 * 1024 * 1024),
        cost_estimate=cost,
    )(x, *weights)

    return out[:B]


def init_params(key, in_dim, hidden, num_layers):
    """Deterministic PyTorch-Linear-style init; weights stored as (fan_in, fan_out)."""
    keys = jax.random.split(key, 4 + 2 * num_layers)
    ki = iter(range(len(keys)))

    def lin(k_w, k_b, fan_in, fan_out):
        bound = 1.0 / jnp.sqrt(jnp.float32(fan_in))
        w = jax.random.uniform(k_w, (fan_in, fan_out), jnp.float32, -bound, bound)
        b = jax.random.uniform(k_b, (1, fan_out), jnp.float32, -bound, bound)
        return w, b

    w_in, b_in = lin(keys[next(ki)], keys[next(ki)], in_dim, hidden)

    w_layers, b_layers = [], []
    for _ in range(num_layers):
        w, b = lin(keys[next(ki)], keys[next(ki)], hidden, hidden)
        w_layers.append(w)
        b_layers.append(b[None])                      # (1, 1, H)
    w_layers = jnp.stack(w_layers, axis=0)            # (L, H, H)
    b_layers = jnp.concatenate(b_layers, axis=0)      # (L, 1, H)

    w_out, b_out = lin(keys[next(ki)], keys[next(ki)], hidden, 1)

    return {"w_in": w_in, "b_in": b_in,
            "w_layers": w_layers, "b_layers": b_layers,
            "w_out": w_out, "b_out": b_out}


def reference_forward(x, params, num_layers, bf16_epilogue):
    """Pure-JAX reference mirroring the kernel's numerics (bf16 matmul inputs,
    f32 accumulation, optional bf16 epilogue)."""
    acc = jnp.bfloat16 if bf16_epilogue else jnp.float32

    def mm(a, w):
        return jnp.dot(a.astype(jnp.bfloat16), w.astype(jnp.bfloat16),
                       preferred_element_type=jnp.float32)

    h = (mm(x, params["w_in"]) + params["b_in"]).astype(acc)
    mid = h
    for i in range(num_layers):
        y = mm(mid, params["w_layers"][i]) + params["b_layers"][i]
        mid = jnp.maximum(y, 0.0).astype(acc)
    res = mid + h
    return jnp.tanh(mm(res, params["w_out"]) + params["b_out"])


def reference_forward_f32(x, params, num_layers):
    """True f32 reference (matches the PyTorch module's numerics)."""
    h = x @ params["w_in"] + params["b_in"]
    mid = h
    for i in range(num_layers):
        mid = jax.nn.relu(mid @ params["w_layers"][i] + params["b_layers"][i])
    res = mid + h
    return jnp.tanh(res @ params["w_out"] + params["b_out"])


if __name__ == "__main__":
    # config: node_embsize=32, IF_disProj=0 -> in_dim = 2*32 + 1 = 65, num_mlp_layers=2
    node_embsize = 32
    num_mlp_layers = 2
    in_dim = node_embsize * 2 + 1
    batch = 512            # -> tb=256, 2 grid steps (both v7x TensorCores busy)

    key = jax.random.PRNGKey(0)
    k_x, k_p = jax.random.split(key)
    x = jax.random.normal(k_x, (batch, in_dim), jnp.float32)
    params = init_params(k_p, in_dim, node_embsize, num_mlp_layers)
    prepared = prepare_params(params)

    bf16_epi = _default_bf16_epilogue()
    flow = resmlp_predictor(x, prepared, num_layers=num_mlp_layers,
                            bf16_epilogue=bf16_epi)
    flow = jax.block_until_ready(flow)
    assert flow.shape == (batch, 1)

    ref_matched = reference_forward(x, params, num_mlp_layers, bf16_epilogue=bf16_epi)
    assert jnp.allclose(flow, ref_matched, atol=2e-3, rtol=2e-3), \
        "mismatch vs matched-numerics reference"

    ref_f32 = reference_forward_f32(x, params, num_mlp_layers)
    assert jnp.allclose(flow, ref_f32, atol=5e-2, rtol=5e-2), \
        "mismatch vs f32 reference"

    print("KERNEL_OK")
</pallas_src>

<mosaic_0001>
module attributes {stable_mosaic.version = 11 : i64} {
  func.func @_resmlp_predictor_kernel(%arg0: i32, %arg1: memref<256x65xf32, #tpu.memory_space<vmem>>, %arg2: memref<65x128xbf16, #tpu.memory_space<vmem>>, %arg3: memref<1x128xf32, #tpu.memory_space<vmem>>, %arg4: memref<2x128x128xbf16, #tpu.memory_space<vmem>>, %arg5: memref<2x1x128xf32, #tpu.memory_space<vmem>>, %arg6: memref<128x1xbf16, #tpu.memory_space<vmem>>, %arg7: memref<1x1xf32, #tpu.memory_space<vmem>>, %arg8: memref<256x1xf32, #tpu.memory_space<vmem>>) attributes {dimension_semantics = [#tpu.dimension_semantics<parallel>], iteration_bounds = array<i64: 2>, scalar_prefetch = 0 : i64, scratch_operands = 0 : i64, tpu.core_type = #tpu.core_type<tc>, window_params = [{transform_indices = @transform_0, window_bounds = array<i64: 256, 65>}, {pipeline_mode = #tpu.pipeline_mode<synchronous>, transform_indices = @transform_1, window_bounds = array<i64: 65, 128>}, {pipeline_mode = #tpu.pipeline_mode<synchronous>, transform_indices = @transform_2, window_bounds = array<i64: 1, 128>}, {pipeline_mode = #tpu.pipeline_mode<synchronous>, transform_indices = @transform_3, window_bounds = array<i64: 2, 128, 128>}, {pipeline_mode = #tpu.pipeline_mode<synchronous>, transform_indices = @transform_4, window_bounds = array<i64: 2, 1, 128>}, {pipeline_mode = #tpu.pipeline_mode<synchronous>, transform_indices = @transform_5, window_bounds = array<i64: 128, 1>}, {pipeline_mode = #tpu.pipeline_mode<synchronous>, transform_indices = @transform_6, window_bounds = array<i64: 1, 1>}, {transform_indices = @transform_7, window_bounds = array<i64: 256, 1>}]} {
    %c0_i32 = arith.constant 0 : i32
    %c2_i32 = arith.constant 2 : i32
    %0 = arith.addi %c0_i32, %c2_i32 : i32
    %c1_i32 = arith.constant 1 : i32
    scf.for %arg9 = %c0_i32 to %0 step %c1_i32  : i32 {
      %c128_i32 = arith.constant 128 : i32
      %1 = arith.muli %arg9, %c128_i32 : i32
      %2 = tpu.assume_multiple %1, 128 : i32
      %3 = arith.index_cast %2 : i32 to index
      %c0 = arith.constant 0 : index
      %4 = vector.load %arg1[%3, %c0] : memref<256x65xf32, #tpu.memory_space<vmem>>, vector<128x65xf32>
      %5 = arith.truncf %4 : vector<128x65xf32> to vector<128x65xbf16>
      %c0_1 = arith.constant 0 : index
      %c0_2 = arith.constant 0 : index
      %6 = vector.load %arg2[%c0_1, %c0_2] : memref<65x128xbf16, #tpu.memory_space<vmem>>, vector<65x128xbf16>
      %cst = arith.constant dense<0.000000e+00> : vector<128x128xf32>
      %7 = tpu.matmul %5, %6, %cst {dimension_numbers = #tpu.dot_dimension_numbers<[1], [0], [0], [1], [0, 0, 1, 1], [], []>} : vector<128x65xbf16>, vector<65x128xbf16>, vector<128x128xf32> -> vector<128x128xf32>
      %c0_3 = arith.constant 0 : index
      %c0_4 = arith.constant 0 : index
      %8 = vector.load %arg3[%c0_3, %c0_4] : memref<1x128xf32, #tpu.memory_space<vmem>>, vector<1x128xf32>
      %9 = vector.broadcast %8 : vector<1x128xf32> to vector<128x128xf32>
      %10 = arith.addf %7, %9 : vector<128x128xf32>
      %11 = arith.truncf %10 : vector<128x128xf32> to vector<128x128xbf16>
      %c0_5 = arith.constant 0 : index
      %c0_6 = arith.constant 0 : index
      %c0_7 = arith.constant 0 : index
      %12 = vector.load %arg4[%c0_5, %c0_6, %c0_7] : memref<2x128x128xbf16, #tpu.memory_space<vmem>>, vector<1x128x128xbf16>
      %13 = vector.shape_cast %12 : vector<1x128x128xbf16> to vector<128x128xbf16>
      %cst_8 = arith.constant dense<0.000000e+00> : vector<128x128xf32>
      %14 = tpu.matmul %11, %13, %cst_8 {dimension_numbers = #tpu.dot_dimension_numbers<[1], [0], [0], [1], [0, 0, 1, 1], [], []>} : vector<128x128xbf16>, vector<128x128xbf16>, vector<128x128xf32> -> vector<128x128xf32>
      %c0_9 = arith.constant 0 : index
      %c0_10 = arith.constant 0 : index
      %c0_11 = arith.constant 0 : index
      %15 = vector.load %arg5[%c0_9, %c0_10, %c0_11] : memref<2x1x128xf32, #tpu.memory_space<vmem>>, vector<1x1x128xf32>
      %16 = vector.shape_cast %15 : vector<1x1x128xf32> to vector<1x128xf32>
      %17 = vector.broadcast %16 : vector<1x128xf32> to vector<128x128xf32>
      %18 = arith.addf %14, %17 : vector<128x128xf32>
      %cst_12 = arith.constant 0.000000e+00 : f32
      %19 = vector.broadcast %cst_12 : f32 to vector<128x128xf32>
      %20 = arith.maximumf %18, %19 : vector<128x128xf32>
      %21 = arith.truncf %20 : vector<128x128xf32> to vector<128x128xbf16>
      %c1 = arith.constant 1 : index
      %c0_13 = arith.constant 0 : index
      %c0_14 = arith.constant 0 : index
      %22 = vector.load %arg4[%c1, %c0_13, %c0_14] : memref<2x128x128xbf16, #tpu.memory_space<vmem>>, vector<1x128x128xbf16>
      %23 = vector.shape_cast %22 : vector<1x128x128xbf16> to vector<128x128xbf16>
      %cst_15 = arith.constant dense<0.000000e+00> : vector<128x128xf32>
      %24 = tpu.matmul %21, %23, %cst_15 {dimension_numbers = #tpu.dot_dimension_numbers<[1], [0], [0], [1], [0, 0, 1, 1], [], []>} : vector<128x128xbf16>, vector<128x128xbf16>, vector<128x128xf32> -> vector<128x128xf32>
      %c1_16 = arith.constant 1 : index
      %c0_17 = arith.constant 0 : index
      %c0_18 = arith.constant 0 : index
      %25 = vector.load %arg5[%c1_16, %c0_17, %c0_18] : memref<2x1x128xf32, #tpu.memory_space<vmem>>, vector<1x1x128xf32>
      %26 = vector.shape_cast %25 : vector<1x1x128xf32> to vector<1x128xf32>
      %27 = vector.broadcast %26 : vector<1x128xf32> to vector<128x128xf32>
      %28 = arith.addf %24, %27 : vector<128x128xf32>
      %cst_19 = arith.constant 0.000000e+00 : f32
      %29 = vector.broadcast %cst_19 : f32 to vector<128x128xf32>
      %30 = arith.maximumf %28, %29 : vector<128x128xf32>
      %31 = arith.truncf %30 : vector<128x128xf32> to vector<128x128xbf16>
      %32 = arith.addf %31, %11 : vector<128x128xbf16>
      %c0_20 = arith.constant 0 : index
      %c0_21 = arith.constant 0 : index
      %33 = vector.load %arg6[%c0_20, %c0_21] : memref<128x1xbf16, #tpu.memory_space<vmem>>, vector<128x1xbf16>
      %cst_22 = arith.constant dense<0.000000e+00> : vector<128x1xf32>
      %34 = tpu.matmul %32, %33, %cst_22 {dimension_numbers = #tpu.dot_dimension_numbers<[1], [0], [0], [1], [0, 0, 1, 1], [], []>} : vector<128x128xbf16>, vector<128x1xbf16>, vector<128x1xf32> -> vector<128x1xf32>
      %c0_23 = arith.constant 0 : index
      %c0_24 = arith.constant 0 : index
      %35 = vector.load %arg7[%c0_23, %c0_24] : memref<1x1xf32, #tpu.memory_space<vmem>>, vector<1x1xf32>
      %36 = vector.broadcast %35 : vector<1x1xf32> to vector<128x1xf32>
      %37 = arith.addf %34, %36 : vector<128x1xf32>
      %38 = math.tanh %37 : vector<128x1xf32>
      %39 = arith.index_cast %2 : i32 to index
      %c0_25 = arith.constant 0 : index
      %40 = vector.load %arg8[%39, %c0_25] : memref<256x1xf32, #tpu.memory_space<vmem>>, vector<128x1xf32>
      tpu.vector_store %arg8[%39, %c0_25], %38 {strides = array<i32>} : memref<256x1xf32, #tpu.memory_space<vmem>>, vector<128x1xf32>,
    }
    %c2_i32_0 = arith.constant 2 : i32
    return
  }
  func.func @transform_0(%arg0: i32) -> (i32, i32) {
    %c0_i32 = arith.constant 0 : i32
    %c0_i32_0 = arith.constant 0 : i32
    return %arg0, %c0_i32 : i32, i32
  }
  func.func @transform_1(%arg0: i32) -> (i32, i32) {
    %c0_i32 = arith.constant 0 : i32
    %c0_i32_0 = arith.constant 0 : i32
    %c0_i32_1 = arith.constant 0 : i32
    return %c0_i32, %c0_i32_0 : i32, i32
  }
  func.func @transform_2(%arg0: i32) -> (i32, i32) {
    %c0_i32 = arith.constant 0 : i32
    %c0_i32_0 = arith.constant 0 : i32
    %c0_i32_1 = arith.constant 0 : i32
    return %c0_i32, %c0_i32_0 : i32, i32
  }
  func.func @transform_3(%arg0: i32) -> (i32, i32, i32) {
    %c0_i32 = arith.constant 0 : i32
    %c0_i32_0 = arith.constant 0 : i32
    %c0_i32_1 = arith.constant 0 : i32
    %c0_i32_2 = arith.constant 0 : i32
    return %c0_i32, %c0_i32_0, %c0_i32_1 : i32, i32, i32
  }
  func.func @transform_4(%arg0: i32) -> (i32, i32, i32) {
    %c0_i32 = arith.constant 0 : i32
    %c0_i32_0 = arith.constant 0 : i32
    %c0_i32_1 = arith.constant 0 : i32
    %c0_i32_2 = arith.constant 0 : i32
    return %c0_i32, %c0_i32_0, %c0_i32_1 : i32, i32, i32
  }
  func.func @transform_5(%arg0: i32) -> (i32, i32) {
    %c0_i32 = arith.constant 0 : i32
    %c0_i32_0 = arith.constant 0 : i32
    %c0_i32_1 = arith.constant 0 : i32
    return %c0_i32, %c0_i32_0 : i32, i32
  }
  func.func @transform_6(%arg0: i32) -> (i32, i32) {
    %c0_i32 = arith.constant 0 : i32
    %c0_i32_0 = arith.constant 0 : i32
    %c0_i32_1 = arith.constant 0 : i32
    return %c0_i32, %c0_i32_0 : i32, i32
  }
  func.func @transform_7(%arg0: i32) -> (i32, i32) {
    %c0_i32 = arith.constant 0 : i32
    %c0_i32_0 = arith.constant 0 : i32
    return %arg0, %c0_i32 : i32, i32
  }
}

</mosaic_0001>

<bundles_post_ra>
// kernel: tpu_custom_call.1
= control target key start
LH: loop header
LB: loop body
LE: loop exit
PB: predicated region body
PF: predicated region fallthrough
CT: control target
= control target key end

     0   :  { %s1548_s26 = smov 0   ;;  %s1790_s0 = inlined_call_operand.vmem [shape: f32[512,65], index: 0, kind: input, shape index: {}]   ;;  %s1791_s1 = inlined_call_operand.vmem [shape: bf16[65,128], index: 1, kind: input, shape index: {}]   ;;  %s1792_s2 = inlined_call_operand.vmem [shape: f32[1,128], index: 2, kind: input, shape index: {}]   ;;  %s1793_s3 = inlined_call_operand.vmem [shape: bf16[2,128,128], index: 3, kind: input, shape index: {}]   ;;  %s1794_s4 = inlined_call_operand.vmem [shape: f32[2,1,128], index: 4, kind: input, shape index: {}]   ;;  %s1795_s5 = inlined_call_operand.vmem [shape: bf16[128,1], index: 5, kind: input, shape index: {}]   ;;  %s1796_s6 = inlined_call_operand.<no memory space> [shape: f32[1,1], index: 6, kind: input, shape index: {}]   ;;  %s1797_s7 = inlined_call_operand.vmem [shape: f32[512,1], index: 7, kind: output, shape index: {}]  }
   0x1   :  { %v12_v0 = vstv %s1796_s6 }
   0x2   :  { %13 = vst [vmem:[#allocation2] sm:$0x1] %v12_v0 }
   0x3 LB: > { %s1157_s27 = sadd.s32 4294967295, %s1498_s26   ;;  %p1161_p0 = scmp.ge.s32.totalorder %s1498_s26, 1  ;;  %s1498_s26 = sphi %s1548_s26, %s19_s26  }
   0x4   : > { %p240_p1 = scmp.lt.s32.totalorder %s1498_s26, 3 }
   0x6   : > { %p241_p2 = pnand %p1161_p0, %p240_p1 }
   0x7   : > { %s1162_s28 = sshll.u32 (!%p241_p2), %s1157_s27, 5  ;;  %s1566_s12 = smov (!%p241_p2), 0  }
   0x8   : > { %244 = sbr.rel (%p241_p2) target bundleno = 898 (0x382), region = 48  ;;  %p273_p3 = scmp.lt.s32.totalorder (!%p241_p2), %s1162_s28, 63 }
   0xd   : > { %s1799_s28 = smov (!%p273_p3, %s1162_s28), 63 }
   0xe   : > { %s1163_s6 = sshll.u32 %s1799_s28, 3 }
   0xf   : > { %s1559_s8 = scalar_lea.vmem %s1790_s0, %s1163_s6  ;;  %s1564_s11 = scalar_lea.vmem %s1797_s7, %s1163_s6 }
  0x10 LB: >> { %v1427_v1 = vld [vmem:[%s1791_s1 + $0x20] ss:$0 sps:$4 sm:$0x11]   ;;  %vm385_vm0 = vcmask 1040384   ;;  %v1504_v2 = vmov 0   ;;  %v1428_v5 = vld [vmem:[%s1791_s1 + $0x18] sm:$0xff]   ;;  %s1502_s12 = sphi %s1566_s12, %s290_s12  }
  0x11   : >> { %v387_v3 = vsel %vm385_vm0, 65535, %v1504_v2  ;;  %s1166_s17 = sshll.u32 %s1502_s12, 7  ;;  %vm360_vm1 = vcmask 531456   ;;  %v1429_v9 = vld [vmem:[%s1791_s1 + $0x10] sm:$0xff]   ;;  %v1430_v10 = vld [vmem:[%s1791_s1 + $0x8] sm:$0xff]   ;;  %v1432_v11 = vld [vmem:[%s1793_s3 + $0x38] sm:$0xff]  }
  0x12   : >> { %v389_v4 = vand.u32 %v1427_v1, %v387_v3  ;;  %s1581_s18 = scalar_lea.vmem %s1559_s8, %s1166_s17  ;;  %v1433_v12 = vld [vmem:[%s1793_s3 + $0x30] sm:$0xff]   ;;  %1314 = vmatprep.subr.bf16.mxu1 %v1432_v11  ;;  %v1431_v13 = vld [vmem:[%s1791_s1] sm:$0xff]   ;;  %v1434_v14 = vld [vmem:[%s1793_s3 + $0x28] sm:$0xff]   ;;  %vm1075_vm2 = vcmask 7168   ;;  %s290_s12 = sadd.s32 1, %s1502_s12  }
  0x13   : >> { %v293_v6 = vld [vmem:[%s1581_s18] sm:$0xff]  ;;  %v294_v7 = vld [vmem:[%s1581_s18 + $0x8] sm:$0xff]  ;;  %1315 = vmatpush3.bf16.msra.mxu1 %v1432_v11  ;;  %v295_v15 = vld [vmem:[%s1581_s18 + $0x10] sm:$0xff]  ;;  %p287_p4 = scmp.ge.s32.totalorder %s290_s12, 2  }
  0x14   : >> { %1288 = vmatprep.subr.bf16.mxu0 %v389_v4  ;;  %v309_v8 = vpack.c.bf16 %v294_v7, %v293_v6  ;;  %1316 = vmatprep.subr.bf16.mxu1 %v1433_v12  ;;  %v296_v16 = vld [vmem:[%s1581_s18 + $0x18] sm:$0xff]  ;;  %v297_v17 = vld [vmem:[%s1581_s18 + $0x20] sm:$0xff]  ;;  %v298_v18 = vld [vmem:[%s1581_s18 + $0x28] sm:$0xff] }
  0x15   : >> { %1289 = vmatpush3.bf16.msra.mxu0 %v389_v4  ;;  %v1435_v19 = vld [vmem:[%s1793_s3 + $0x20] sm:$0xff]   ;;  %v310_v20 = vpack.c.bf16 %v296_v16, %v295_v15  ;;  %v1436_v21 = vld [vmem:[%s1793_s3 + $0x18] sm:$0xff]   ;;  %v311_v22 = vpack.c.bf16 %v298_v18, %v297_v17  ;;  %v299_v23 = vld [vmem:[%s1581_s18 + $0x30] sm:$0xff] }
  0x16   : >> { %1290 = vmatprep.subr.bf16.mxu0 %v1428_v5  ;;  %1298 = vmatprep.mubr.msk.bf16.mxu0 %vm360_vm1, %v309_v8  ;;  %v300_v24 = vld [vmem:[%s1581_s18 + $0x38] sm:$0xff]  ;;  %v301_v25 = vld [vmem:[%s1581_s18 + $0x40] sm:$0xff]  ;;  %v302_v26 = vld [vmem:[%s1581_s18 + $0x48] sm:$0xff] }
  0x17   : >> { %1317 = vmatpush3.bf16.msra.mxu1 %v1433_v12  ;;  %v312_v27 = vpack.c.bf16 %v300_v24, %v299_v23  ;;  %v313_v28 = vpack.c.bf16 %v302_v26, %v301_v25  ;;  %v303_v29 = vld [vmem:[%s1581_s18 + $0x50] sm:$0xff]  ;;  %v304_v30 = vld [vmem:[%s1581_s18 + $0x58] sm:$0xff]  ;;  %v305_v31 = vld [vmem:[%s1581_s18 + $0x60] sm:$0xff] }
  0x18   : >> { %1318 = vmatprep.subr.bf16.mxu1 %v1434_v14  ;;  %v306_v32 = vld [vmem:[%s1581_s18 + $0x68] sm:$0xff]  ;;  %v314_v33 = vpack.c.bf16 %v304_v30, %v303_v29  ;;  %v307_v35 = vld [vmem:[%s1581_s18 + $0x70] sm:$0xff]  ;;  %v308_v36 = vld [vmem:[%s1581_s18 + $0x78] sm:$0xff]  ;;  %s1741_s18 = scalar_lea.vmem %s1564_s11, %s1166_s17 }
  0x19   : >> { %1291 = vmatpush3.bf16.msra.mxu0 %v1428_v5  ;;  %v315_v34 = vpack.c.bf16 %v306_v32, %v305_v31  ;;  %v316_v37 = vpack.c.bf16 %v308_v36, %v307_v35  ;;  %v1437_v38 = vld [vmem:[%s1793_s3 + $0x10] sm:$0xff]   ;;  %v1438_v39 = vld [vmem:[%s1793_s3 + $0x8] sm:$0xff]   ;;  %v1439_v40 = vld [vmem:[%s1793_s3] sm:$0xff]  }
  0x1a   : >> { %1292 = vmatprep.subr.bf16.mxu0 %v1429_v9  ;;  %v1440_v41 = vld [vmem:[%s1793_s3 + $0x78] sm:$0xff]   ;;  %v1441_v42 = vld [vmem:[%s1793_s3 + $0x70] sm:$0xff]   ;;  %v1442_v43 = vld [vmem:[%s1793_s3 + $0x68] sm:$0xff]  }
  0x1b   : >> { %1319 = vmatpush3.bf16.msra.mxu1 %v1434_v14  ;;  %v1443_v44 = vld [vmem:[%s1793_s3 + $0x60] sm:$0xff]   ;;  %v1444_v45 = vld [vmem:[%s1793_s3 + $0x58] sm:$0xff]   ;;  %v1445_v23 = vld [vmem:[%s1793_s3 + $0x50] sm:$0xff]  }
  0x1c   : >> { %1320 = vmatprep.subr.bf16.mxu1 %v1435_v19  ;;  %v1167_v49 = vld [vmem:[%s1792_s2] ss:$0 sm:$0xff]  ;;  %v1446_v24 = vld [vmem:[%s1793_s3 + $0x48] sm:$0xff]   ;;  %v1448_v26 = vld [vmem:[%s1795_s5 + $0x38] sm:$0xff]  }
  0x1d   : >> { %1293 = vmatpush3.bf16.msra.mxu0 %v1429_v9  ;;  %v1447_v25 = vld [vmem:[%s1793_s3 + $0x40] sm:$0xff]   ;;  %v1452_v30 = vld [vmem:[%s1795_s5 + $0x18] sm:$0xff]  }
  0x1e   : >> { %1294 = vmatprep.subr.bf16.mxu0 %v1430_v10  ;;  %v1451_v29 = vld [vmem:[%s1795_s5 + $0x20] sm:$0xff]  }
  0x1f   : >> { %1321 = vmatpush3.bf16.msra.mxu1 %v1435_v19 }
  0x20   : >> { %1322 = vmatprep.subr.bf16.mxu1 %v1436_v21 }
  0x21   : >> { %1295 = vmatpush3.bf16.msra.mxu0 %v1430_v10 }
  0x22   : >> { %1296 = vmatprep.subr.bf16.mxu0 %v1431_v13 }
  0x23   : >> { %1323 = vmatpush3.bf16.msra.mxu1 %v1436_v21 }
  0x24   : >> { %1324 = vmatprep.subr.bf16.mxu1 %v1437_v38 }
  0x25   : >> { %1297 = vmatpush3.bf16.msra.mxu0 %v1431_v13 }
  0x26   : >> { %1346 = vmatprep.subr.bf16.mxu0 %v1440_v41 }
  0x27   : >> { %1325 = vmatpush3.bf16.msra.mxu1 %v1437_v38 }
  0x28   : >> { %1299 = vmatmul.mubr.msk.bf16.vlgmr.msra.gmra.mxu0 %vm360_vm1, %v310_v20  ;;  %1326 = vmatprep.subr.bf16.mxu1 %v1438_v39 }
  0x29   : >> { %1302 = vmatprep.mubr.msk.bf16.mxu0 %vm360_vm1, %v311_v22  ;;  %1347 = vmatpush3.bf16.msra.mxu0 %v1440_v41 }
  0x2a   : >> { %1348 = vmatprep.subr.bf16.mxu0 %v1441_v42 }
  0x2b   : >> { %1327 = vmatpush3.bf16.msra.mxu1 %v1438_v39 }
  0x2c   : >> { %1328 = vmatprep.subr.bf16.mxu1 %v1439_v40 }
  0x2d   : >> { %1349 = vmatpush3.bf16.msra.mxu0 %v1441_v42 }
  0x2e   : >> { %1350 = vmatprep.subr.bf16.mxu0 %v1442_v43 }
  0x2f   : >> { %1329 = vmatpush3.bf16.msra.mxu1 %v1439_v40 }
  0x30   : >> { %1303 = vmatmul.mubr.msk.bf16.gmra.mxu0 %vm360_vm1, %v312_v27  ;;  %v1449_v27 = vld [vmem:[%s1795_s5 + $0x30] sm:$0xff]   ;;  %1378 = vmatprep.subr.bf16.mxu1 %v1448_v26 }
  0x31   : >> { %1306 = vmatprep.mubr.msk.bf16.mxu0 %vm360_vm1, %v313_v28  ;;  %1351 = vmatpush3.bf16.msra.mxu0 %v1442_v43  ;;  %v1450_v28 = vld [vmem:[%s1795_s5 + $0x28] sm:$0xff]  }
  0x32   : >> { %1352 = vmatprep.subr.bf16.mxu0 %v1443_v44 }
  0x35   : >> { %1353 = vmatpush3.bf16.msra.mxu0 %v1443_v44 }
  0x36   : >> { %1354 = vmatprep.subr.bf16.mxu0 %v1444_v45 }
  0x38   : >> { %1307 = vmatmul.mubr.msk.bf16.gmra.mxu0 %vm360_vm1, %v314_v33  ;;  %v1181_v33 = vld [vmem:[%s1794_s4] ss:$0 sm:$0xff] }
  0x39   : >> { %1310 = vmatprep.mubr.msk.bf16.mxu0 %vm360_vm1, %v315_v34  ;;  %1355 = vmatpush3.bf16.msra.mxu0 %v1444_v45 }
  0x3a   : >> { %1356 = vmatprep.subr.bf16.mxu0 %v1445_v23 }
  0x3d   : >> { %1357 = vmatpush3.bf16.msra.mxu0 %v1445_v23 }
  0x3e   : >> { %1358 = vmatprep.subr.bf16.mxu0 %v1446_v24 }
  0x40   : >> { %1311 = vmatmul.mubr.msk.bf16.gmra.mxu0 %vm360_vm1, %v316_v37 }
  0x41   : >> { %1359 = vmatpush3.bf16.msra.mxu0 %v1446_v24 }
  0x42   : >> { %1360 = vmatprep.subr.bf16.mxu0 %v1447_v25 }
  0x45   : >> { %1361 = vmatpush3.bf16.msra.mxu0 %v1447_v25 }
  0xe8   : >> { %v1300_v46 = vpop.f32.mrf.mxu0 }
  0xe9   : >> { %v434_v54 = vadd.f32 %v1300_v46, %v1167_v49 }
  0xea   : >> { %v425_v47 = vpop.f32.mrf.mxu0 }
  0xeb   : >> { %v426_v52 = vadd.f32 %v1167_v49, %v425_v47 }
  0xec   : >> { %v1301_v48 = vpop.f32.mrf.mxu0 }
  0xed   : >> { %v437_v50 = vadd.f32 %v1301_v48, %v1167_v49 }
  0xee   : >> { %v428_v51 = vpop.f32.mrf.mxu0 }
  0xef   : >> { %v429_v53 = vadd.f32 %v1167_v49, %v428_v51  ;;  %v1660_v57 = vpack.c.bf16 %v437_v50, %v434_v54 }
  0xf0   : >> { %v1304_v55 = vpop.f32.mrf.mxu0 }
  0xf1   : >> { %v1658_v56 = vpack.c.bf16 %v429_v53, %v426_v52  ;;  %v450_v0 = vadd.f32 %v1304_v55, %v1167_v49 }
  0xf2   : >> { %v441_v58 = vpop.f32.mrf.mxu0 }
  0xf3   : >> { %1330 = vmatprep.mubr.bf16.mxu1 %v1658_v56  ;;  %v442_v62 = vadd.f32 %v1167_v49, %v441_v58 }
  0xf4   : >> { %v1305_v59 = vpop.f32.mrf.mxu0  ;;  %1331 = vmatmul.mubr.bf16.vlgmr.msra.gmra.mxu1 %v1660_v57 }
  0xf5   : >> { %v453_v60 = vadd.f32 %v1305_v59, %v1167_v49  ;;  %1379 = vmatpush3.bf16.msra.mxu1 %v1448_v26 }
  0xf6   : >> { %v444_v61 = vpop.f32.mrf.mxu0  ;;  %1380 = vmatprep.subr.bf16.mxu1 %v1449_v27 }
  0xf7   : >> { %v445_v63 = vadd.f32 %v1167_v49, %v444_v61  ;;  %v1666_v3 = vpack.c.bf16 %v453_v60, %v450_v0 }
  0xf8   : >> { %v1308_v1 = vpop.f32.mrf.mxu0 }
  0xf9   : >> { %v1664_v2 = vpack.c.bf16 %v445_v63, %v442_v62  ;;  %v466_v10 = vadd.f32 %v1308_v1, %v1167_v49  ;;  %1381 = vmatpush3.bf16.msra.mxu1 %v1449_v27 }
  0xfa   : >> { %v457_v4 = vpop.f32.mrf.mxu0  ;;  %1382 = vmatprep.subr.bf16.mxu1 %v1450_v28 }
  0xfb   : >> { %1334 = vmatprep.mubr.bf16.mxu1 %v1664_v2  ;;  %v458_v8 = vadd.f32 %v1167_v49, %v457_v4 }
  0xfc   : >> { %v1309_v5 = vpop.f32.mrf.mxu0  ;;  %1335 = vmatmul.mubr.bf16.gmra.mxu1 %v1666_v3 }
  0xfd   : >> { %v469_v6 = vadd.f32 %v1309_v5, %v1167_v49  ;;  %1383 = vmatpush3.bf16.msra.mxu1 %v1450_v28 }
  0xfe   : >> { %v460_v7 = vpop.f32.mrf.mxu0  ;;  %1384 = vmatprep.subr.bf16.mxu1 %v1451_v29 }
  0xff   : >> { %v461_v9 = vadd.f32 %v1167_v49, %v460_v7  ;;  %v1672_v13 = vpack.c.bf16 %v469_v6, %v466_v10 }
 0x100   : >> { %v1312_v11 = vpop.f32.mrf.mxu0 }
 0x101   : >> { %v1670_v12 = vpack.c.bf16 %v461_v9, %v458_v8  ;;  %v482_v20 = vadd.f32 %v1312_v11, %v1167_v49  ;;  %1385 = vmatpush3.bf16.msra.mxu1 %v1451_v29 }
 0x102   : >> { %v473_v14 = vpop.f32.mrf.mxu0  ;;  %1386 = vmatprep.subr.bf16.mxu1 %v1452_v30 }
 0x103   : >> { %1338 = vmatprep.mubr.bf16.mxu1 %v1670_v12  ;;  %v474_v18 = vadd.f32 %v1167_v49, %v473_v14 }
 0x104   : >> { %v1313_v15 = vpop.f32.mrf.mxu0  ;;  %1339 = vmatmul.mubr.bf16.gmra.mxu1 %v1672_v13 }
 0x105   : >> { %v485_v16 = vadd.f32 %v1313_v15, %v1167_v49  ;;  %1387 = vmatpush3.bf16.msra.mxu1 %v1452_v30 }
 0x106   : >> { %v476_v17 = vpop.f32.mrf.mxu0 }
 0x107   : >> { %v477_v19 = vadd.f32 %v1167_v49, %v476_v17  ;;  %v1678_v22 = vpack.c.bf16 %v485_v16, %v482_v20 }
 0x109   : >> { %v1676_v21 = vpack.c.bf16 %v477_v19, %v474_v18 }
 0x10b   : >> { %1342 = vmatprep.mubr.bf16.mxu1 %v1676_v21 }
 0x10c   : >> { %1343 = vmatmul.mubr.bf16.gmra.mxu1 %v1678_v22 }
 0x1b4   : >> { %v1332_v31 = vpop.f32.mrf.mxu1 }
 0x1b5   : >> { %v610_v37 = vadd.f32 %v1332_v31, %v1181_v33 }
 0x1b6   : >> { %v601_v32 = vpop.f32.mrf.mxu1 }
 0x1b7   : >> { %v602_v35 = vadd.f32 %v1181_v33, %v601_v32  ;;  %v666_v44 = vmax.f32 %v610_v37, 0.0  ;;  %v1453_v32 = vld [vmem:[%s1795_s5 + $0x10] sm:$0xff]  }
 0x1b8   : >> { %v1333_v34 = vpop.f32.mrf.mxu1  ;;  %1388 = vmatprep.subr.bf16.mxu1 %v1453_v32 }
 0x1b9   : >> { %v613_v36 = vadd.f32 %v1333_v34, %v1181_v33  ;;  %v664_v42 = vmax.f32 %v602_v35, 0.0  ;;  %1389 = vmatpush3.bf16.msra.mxu1 %v1453_v32  ;;  %v1454_v34 = vld [vmem:[%s1795_s5 + $0x8] sm:$0xff]  }
 0x1ba   : >> { %v604_v38 = vpop.f32.mrf.mxu1  ;;  %1390 = vmatprep.subr.bf16.mxu1 %v1454_v34 }
 0x1bb   : >> { %v605_v39 = vadd.f32 %v1181_v33, %v604_v38  ;;  %v667_v40 = vmax.f32 %v613_v36, 0.0  ;;  %v1207_v36 = vld [vmem:[%s1794_s4 + $0x1] ss:$0 sm:$0xff] }
 0x1bc   : >> { %v1336_v41 = vpop.f32.mrf.mxu1 }
 0x1bd   : >> { %v665_v43 = vmax.f32 %v605_v39, 0.0  ;;  %v681_v47 = vpack.c.bf16 %v667_v40, %v666_v44  ;;  %v626_v51 = vadd.f32 %v1336_v41, %v1181_v33  ;;  %1391 = vmatpush3.bf16.msra.mxu1 %v1454_v34 }
 0x1be   : >> { %v617_v45 = vpop.f32.mrf.mxu1 }
 0x1bf   : >> { %v680_v46 = vpack.c.bf16 %v665_v43, %v664_v42  ;;  %v618_v49 = vadd.f32 %v1181_v33, %v617_v45  ;;  %v670_v60 = vmax.f32 %v626_v51, 0.0 }
 0x1c0   : >> { %v1337_v48 = vpop.f32.mrf.mxu1 }
 0x1c1   : >> { %v629_v50 = vadd.f32 %v1337_v48, %v1181_v33  ;;  %1362 = vmatprep.mubr.bf16.mxu0 %v680_v46  ;;  %v668_v58 = vmax.f32 %v618_v49, 0.0 }
 0x1c2   : >> { %v620_v52 = vpop.f32.mrf.mxu1  ;;  %1363 = vmatmul.mubr.bf16.vlgmr.msra.gmra.mxu0 %v681_v47 }
 0x1c3   : >> { %v621_v53 = vadd.f32 %v1181_v33, %v620_v52  ;;  %v671_v54 = vmax.f32 %v629_v50, 0.0 }
 0x1c4   : >> { %v1340_v55 = vpop.f32.mrf.mxu1 }
 0x1c5   : >> { %v669_v59 = vmax.f32 %v621_v53, 0.0  ;;  %v683_v63 = vpack.c.bf16 %v671_v54, %v670_v60  ;;  %v642_v5 = vadd.f32 %v1340_v55, %v1181_v33 }
 0x1c6   : >> { %v633_v61 = vpop.f32.mrf.mxu1 }
 0x1c7   : >> { %v682_v62 = vpack.c.bf16 %v669_v59, %v668_v58  ;;  %v634_v1 = vadd.f32 %v1181_v33, %v633_v61  ;;  %v674_v14 = vmax.f32 %v642_v5, 0.0 }
 0x1c8   : >> { %v1341_v0 = vpop.f32.mrf.mxu1 }
 0x1c9   : >> { %v645_v4 = vadd.f32 %v1341_v0, %v1181_v33  ;;  %1366 = vmatprep.mubr.bf16.mxu0 %v682_v62  ;;  %v672_v10 = vmax.f32 %v634_v1, 0.0 }
 0x1ca   : >> { %v636_v6 = vpop.f32.mrf.mxu1  ;;  %1367 = vmatmul.mubr.bf16.gmra.mxu0 %v683_v63 }
 0x1cb   : >> { %v637_v7 = vadd.f32 %v1181_v33, %v636_v6  ;;  %v675_v8 = vmax.f32 %v645_v4, 0.0 }
 0x1cc   : >> { %v1344_v9 = vpop.f32.mrf.mxu1 }
 0x1cd   : >> { %v673_v11 = vmax.f32 %v637_v7, 0.0  ;;  %v685_v17 = vpack.c.bf16 %v675_v8, %v674_v14  ;;  %v658_v23 = vadd.f32 %v1344_v9, %v1181_v33 }
 0x1ce   : >> { %v649_v15 = vpop.f32.mrf.mxu1 }
 0x1cf   : >> { %v684_v16 = vpack.c.bf16 %v673_v11, %v672_v10  ;;  %v650_v19 = vadd.f32 %v1181_v33, %v649_v15  ;;  %v678_v29 = vmax.f32 %v658_v23, 0.0 }
 0x1d0   : >> { %v1345_v18 = vpop.f32.mrf.mxu1 }
 0x1d1   : >> { %v661_v20 = vadd.f32 %v1345_v18, %v1181_v33  ;;  %1370 = vmatprep.mubr.bf16.mxu0 %v684_v16  ;;  %v676_v27 = vmax.f32 %v650_v19, 0.0 }
 0x1d2   : >> { %v652_v24 = vpop.f32.mrf.mxu1  ;;  %1371 = vmatmul.mubr.bf16.gmra.mxu0 %v685_v17 }
 0x1d3   : >> { %v653_v25 = vadd.f32 %v1181_v33, %v652_v24  ;;  %v679_v26 = vmax.f32 %v661_v20, 0.0  ;;  %v1455_v33 = vld [vmem:[%s1795_s5] sm:$0xff]  }
 0x1d4   : >> { %1392 = vmatprep.subr.bf16.mxu1 %v1455_v33 }
 0x1d5   : >> { %v677_v28 = vmax.f32 %v653_v25, 0.0  ;;  %v687_v31 = vpack.c.bf16 %v679_v26, %v678_v29  ;;  %1393 = vmatpush3.bf16.msra.mxu1 %v1455_v33 }
 0x1d7   : >> { %v686_v30 = vpack.c.bf16 %v677_v28, %v676_v27 }
 0x1d9   : >> { %1374 = vmatprep.mubr.bf16.mxu0 %v686_v30 }
 0x1da   : >> { %1375 = vmatmul.mubr.bf16.gmra.mxu0 %v687_v31 }
 0x282   : >> { %v1364_v35 = vpop.f32.mrf.mxu0 }
 0x283   : >> { %v804_v38 = vadd.f32 %v1364_v35, %v1207_v36 }
 0x284   : >> { %v795_v37 = vpop.f32.mrf.mxu0 }
 0x285   : >> { %v796_v40 = vadd.f32 %v1207_v36, %v795_v37  ;;  %v860_v45 = vmax.f32 %v804_v38, 0.0 }
 0x286   : >> { %v1365_v39 = vpop.f32.mrf.mxu0 }
 0x287   : >> { %v807_v41 = vadd.f32 %v1365_v39, %v1207_v36  ;;  %v858_v47 = vmax.f32 %v796_v40, 0.0 }
 0x288   : >> { %v798_v42 = vpop.f32.mrf.mxu0 }
 0x289   : >> { %v861_v43 = vmax.f32 %v807_v41, 0.0  ;;  %v799_v44 = vadd.f32 %v1207_v36, %v798_v42  ;;  %v1729_v41 = vld [vmem:[#allocation2] ss:$0 sm:$0xff] }
 0x28a   : >> { %v1368_v46 = vpop.f32.mrf.mxu0 }
 0x28b   : >> { %v859_v48 = vmax.f32 %v799_v44, 0.0  ;;  %v875_v49 = vpack.c.bf16 %v861_v43, %v860_v45  ;;  %v820_v52 = vadd.f32 %v1368_v46, %v1207_v36 }
 0x28c   : >> { %v811_v50 = vpop.f32.mrf.mxu0 }
 0x28d   : >> { %v874_v51 = vpack.c.bf16 %v859_v48, %v858_v47  ;;  %v812_v54 = vadd.f32 %v1207_v36, %v811_v50  ;;  %v883_v59 = vadd.bf16 %v875_v49, %v1660_v57  ;;  %v864_v63 = vmax.f32 %v820_v52, 0.0 }
 0x28e   : >> { %v1369_v53 = vpop.f32.mrf.mxu0 }
 0x28f   : >> { %v823_v55 = vadd.f32 %v1369_v53, %v1207_v36  ;;  %v882_v58 = vadd.bf16 %v874_v51, %v1658_v56  ;;  %v862_v1 = vmax.f32 %v812_v54, 0.0 }
 0x290   : >> { %v814_v60 = vpop.f32.mrf.mxu0 }
 0x291   : >> { %v865_v61 = vmax.f32 %v823_v55, 0.0  ;;  %v815_v62 = vadd.f32 %v1207_v36, %v814_v60  ;;  %1394 = vmatprep.mubr.bf16.mxu1 %v882_v58 }
 0x292   : >> { %v1372_v0 = vpop.f32.mrf.mxu0  ;;  %1395 = vmatmul.mubr.bf16.vlgmr.msra.gmra.mxu1 %v883_v59 }
 0x293   : >> { %v863_v4 = vmax.f32 %v815_v62, 0.0  ;;  %v877_v5 = vpack.c.bf16 %v865_v61, %v864_v63  ;;  %v836_v8 = vadd.f32 %v1372_v0, %v1207_v36 }
 0x294   : >> { %v827_v6 = vpop.f32.mrf.mxu0 }
 0x295   : >> { %v876_v7 = vpack.c.bf16 %v863_v4, %v862_v1  ;;  %v828_v10 = vadd.f32 %v1207_v36, %v827_v6  ;;  %v885_v57 = vadd.bf16 %v877_v5, %v1666_v3  ;;  %v868_v17 = vmax.f32 %v836_v8, 0.0 }
 0x296   : >> { %v1373_v9 = vpop.f32.mrf.mxu0 }
 0x297   : >> { %v839_v11 = vadd.f32 %v1373_v9, %v1207_v36  ;;  %v884_v56 = vadd.bf16 %v876_v7, %v1664_v2  ;;  %v866_v19 = vmax.f32 %v828_v10, 0.0 }
 0x298   : >> { %v830_v14 = vpop.f32.mrf.mxu0 }
 0x299   : >> { %v869_v15 = vmax.f32 %v839_v11, 0.0  ;;  %v831_v16 = vadd.f32 %v1207_v36, %v830_v14  ;;  %1398 = vmatprep.mubr.bf16.mxu1 %v884_v56 }
 0x29a   : >> { %v1376_v18 = vpop.f32.mrf.mxu0  ;;  %1399 = vmatmul.mubr.bf16.gmra.mxu1 %v885_v57 }
 0x29b   : >> { %v867_v20 = vmax.f32 %v831_v16, 0.0  ;;  %v879_v23 = vpack.c.bf16 %v869_v15, %v868_v17  ;;  %v852_v26 = vadd.f32 %v1376_v18, %v1207_v36 }
 0x29c   : >> { %v843_v24 = vpop.f32.mrf.mxu0 }
 0x29d   : >> { %v878_v25 = vpack.c.bf16 %v867_v20, %v866_v19  ;;  %v844_v28 = vadd.f32 %v1207_v36, %v843_v24  ;;  %v887_v3 = vadd.bf16 %v879_v23, %v1672_v13  ;;  %v872_v34 = vmax.f32 %v852_v26, 0.0 }
 0x29e   : >> { %v1377_v27 = vpop.f32.mrf.mxu0 }
 0x29f   : >> { %v855_v29 = vadd.f32 %v1377_v27, %v1207_v36  ;;  %v886_v2 = vadd.bf16 %v878_v25, %v1670_v12  ;;  %v870_v33 = vmax.f32 %v844_v28, 0.0 }
 0x2a0   : >> { %v846_v30 = vpop.f32.mrf.mxu0 }
 0x2a1   : >> { %v873_v31 = vmax.f32 %v855_v29, 0.0  ;;  %v847_v32 = vadd.f32 %v1207_v36, %v846_v30  ;;  %1402 = vmatprep.mubr.bf16.mxu1 %v886_v2 }
 0x2a2   : >> { %1403 = vmatmul.mubr.bf16.gmra.mxu1 %v887_v3 }
 0x2a3   : >> { %v871_v35 = vmax.f32 %v847_v32, 0.0  ;;  %v881_v37 = vpack.c.bf16 %v873_v31, %v872_v34 }
 0x2a5   : >> { %v880_v38 = vpack.c.bf16 %v871_v35, %v870_v33  ;;  %v889_v40 = vadd.bf16 %v881_v37, %v1678_v22 }
 0x2a7   : >> { %v888_v39 = vadd.bf16 %v880_v38, %v1676_v21 }
 0x2a9   : >> { %1406 = vmatprep.mubr.bf16.mxu1 %v888_v39 }
 0x2aa   : >> { %1407 = vmatmul.mubr.bf16.gmra.mxu1 %v889_v40 }
 0x352   : >> { %v1396_v12 = vpop.f32.mrf.mxu1 }
 0x353   : >> { %v1004_v13 = vadd.f32 %v1396_v12, %v1729_v41 }
 0x354   : >> { %v995_v42 = vpop.f32.mrf.mxu1 }
 0x355   : >> { %1456 = vtanh.f32 %v1004_v13  ;;  %v996_v36 = vadd.f32 %v1729_v41, %v995_v42 }
 0x356   : >> { %v1397_v43 = vpop.f32.mrf.mxu1 }
 0x357   : >> { %1458 = vtanh.f32 %v996_v36  ;;  %v1007_v44 = vadd.f32 %v1397_v43, %v1729_v41 }
 0x358   : >> { %v998_v21 = vpop.f32.mrf.mxu1 }
 0x359   : >> { %1460 = vtanh.f32 %v1007_v44  ;;  %v999_v22 = vadd.f32 %v1729_v41, %v998_v21 }
 0x35a   : >> { %v1400_v45 = vpop.f32.mrf.mxu1 }
 0x35b   : >> { %1462 = vtanh.f32 %v999_v22  ;;  %v1020_v46 = vadd.f32 %v1400_v45, %v1729_v41 }
 0x35c   : >> { %v1011_v47 = vpop.f32.mrf.mxu1 }
 0x35d   : >> { %1464 = vtanh.f32 %v1020_v46  ;;  %v1012_v48 = vadd.f32 %v1729_v41, %v1011_v47 }
 0x35e   : >> { %v1401_v49 = vpop.f32.mrf.mxu1 }
 0x35f   : >> { %1466 = vtanh.f32 %v1012_v48  ;;  %v1023_v50 = vadd.f32 %v1401_v49, %v1729_v41 }
 0x360   : >> { %v1014_v51 = vpop.f32.mrf.mxu1 }
 0x361   : >> { %1468 = vtanh.f32 %v1023_v50  ;;  %v1015_v52 = vadd.f32 %v1729_v41, %v1014_v51 }
 0x362   : >> { %v1457_v53 = vpop.eup %1456  ;;  %v1404_v54 = vpop.f32.mrf.mxu1 }
 0x363   : >> { %1078 = vst.msk [vmem:[%s1741_s18 + $0x10] sm:$0xff] %vm1075_vm2, %v1457_v53  ;;  %1470 = vtanh.f32 %v1015_v52  ;;  %v1036_v55 = vadd.f32 %v1404_v54, %v1729_v41 }
 0x364   : >> { %v1459_v58 = vpop.eup %1458  ;;  %v1027_v59 = vpop.f32.mrf.mxu1 }
 0x365   : >> { %1076 = vst.msk [vmem:[%s1741_s18] sm:$0xff] %vm1075_vm2, %v1459_v58  ;;  %1472 = vtanh.f32 %v1036_v55  ;;  %v1028_v60 = vadd.f32 %v1729_v41, %v1027_v59 }
 0x366   : >> { %v1461_v61 = vpop.eup %1460  ;;  %v1405_v62 = vpop.f32.mrf.mxu1 }
 0x367   : >> { %1079 = vst.msk [vmem:[%s1741_s18 + $0x18] sm:$0xff] %vm1075_vm2, %v1461_v61  ;;  %1474 = vtanh.f32 %v1028_v60  ;;  %v1039_v63 = vadd.f32 %v1405_v62, %v1729_v41 }
 0x368   : >> { %v1463_v0 = vpop.eup %1462  ;;  %v1030_v1 = vpop.f32.mrf.mxu1 }
 0x369   : >> { %1077 = vst.msk [vmem:[%s1741_s18 + $0x8] sm:$0xff] %vm1075_vm2, %v1463_v0  ;;  %1476 = vtanh.f32 %v1039_v63  ;;  %v1031_v4 = vadd.f32 %v1729_v41, %v1030_v1 }
 0x36a   : >> { %v1465_v5 = vpop.eup %1464  ;;  %v1408_v6 = vpop.f32.mrf.mxu1 }
 0x36b   : >> { %1082 = vst.msk [vmem:[%s1741_s18 + $0x30] sm:$0xff] %vm1075_vm2, %v1465_v5  ;;  %1478 = vtanh.f32 %v1031_v4  ;;  %v1052_v7 = vadd.f32 %v1408_v6, %v1729_v41 }
 0x36c   : >> { %v1467_v8 = vpop.eup %1466  ;;  %v1043_v9 = vpop.f32.mrf.mxu1 }
 0x36d   : >> { %1080 = vst.msk [vmem:[%s1741_s18 + $0x20] sm:$0xff] %vm1075_vm2, %v1467_v8  ;;  %1480 = vtanh.f32 %v1052_v7  ;;  %v1044_v10 = vadd.f32 %v1729_v41, %v1043_v9 }
 0x36e   : >> { %v1469_v11 = vpop.eup %1468  ;;  %v1409_v56 = vpop.f32.mrf.mxu1 }
 0x36f   : >> { %1083 = vst.msk [vmem:[%s1741_s18 + $0x38] sm:$0xff] %vm1075_vm2, %v1469_v11  ;;  %1482 = vtanh.f32 %v1044_v10  ;;  %v1055_v14 = vadd.f32 %v1409_v56, %v1729_v41 }
 0x370   : >> { %v1471_v57 = vpop.eup %1470  ;;  %v1046_v15 = vpop.f32.mrf.mxu1 }
 0x371   : >> { %1081 = vst.msk [vmem:[%s1741_s18 + $0x28] sm:$0xff] %vm1075_vm2, %v1471_v57  ;;  %1484 = vtanh.f32 %v1055_v14  ;;  %v1047_v16 = vadd.f32 %v1729_v41, %v1046_v15 }
 0x372   : >> { %v1473_v17 = vpop.eup %1472 }
 0x373   : >> { %1086 = vst.msk [vmem:[%s1741_s18 + $0x50] sm:$0xff] %vm1075_vm2, %v1473_v17  ;;  %1486 = vtanh.f32 %v1047_v16 }
 0x374   : >> { %v1475_v18 = vpop.eup %1474 }
 0x375   : >> { %1084 = vst.msk [vmem:[%s1741_s18 + $0x40] sm:$0xff] %vm1075_vm2, %v1475_v18 }
 0x376   : >> { %v1477_v19 = vpop.eup %1476 }
 0x377   : >> { %1087 = vst.msk [vmem:[%s1741_s18 + $0x58] sm:$0xff] %vm1075_vm2, %v1477_v19 }
 0x378   : >> { %v1479_v20 = vpop.eup %1478 }
 0x379   : >> { %1085 = vst.msk [vmem:[%s1741_s18 + $0x48] sm:$0xff] %vm1075_vm2, %v1479_v20 }
 0x37a   : >> { %v1481_v23 = vpop.eup %1480 }
 0x37b   : >> { %1090 = vst.msk [vmem:[%s1741_s18 + $0x70] sm:$0xff] %vm1075_vm2, %v1481_v23 }
 0x37c   : >> { %v1483_v24 = vpop.eup %1482 }
 0x37d   : >> { %1088 = vst.msk [vmem:[%s1741_s18 + $0x60] sm:$0xff] %vm1075_vm2, %v1483_v24  ;;  %289 = sbr.rel (!%p287_p4) target bundleno = 16 (0x10), region = 89 }
 0x37e   : >> { %v1485_v25 = vpop.eup %1484 }
 0x37f   : >> { %1091 = vst.msk [vmem:[%s1741_s18 + $0x78] sm:$0xff] %vm1075_vm2, %v1485_v25 }
 0x380   : >> { %v1487_v26 = vpop.eup %1486 }
 0x381   : >> { %1089 = vst.msk [vmem:[%s1741_s18 + $0x68] sm:$0xff] %vm1075_vm2, %v1487_v26 }
 0x382 PF: > { %s19_s26 = sadd.s32 1, %s1498_s26  }
 0x383   : > { %p16_p5 = scmp.ge.s32.totalorder %s19_s26, 4  }
 0x385   :  { %18 = sbr.rel (!%p16_p5) target bundleno = 3 (0x3), region = 100 }

</bundles_post_ra>
